<compile_context>
chip_gen: v6e
topology: v6e:2x2x1
jax: 0.10.0
libtpu: 0.0.40
codegen_flags: <defaults>
</compile_context>

<pallas_src>
import functools

import jax
import jax.numpy as jnp
from jax.experimental import pallas as pl
from jax.experimental.pallas import tpu as pltpu


def _label_smooth_ce_kernel(logits_ref, label_ref, loss_ref,
                            loss_acc, valid_acc, *,
                            lb_pos, lb_neg, lb_ignore, n_rows, tile_n):
    pid = pl.program_id(0)

    @pl.when(pid == 0)
    def _init():
        loss_acc[0] = jnp.float32(0.0)
        valid_acc[0] = jnp.float32(0.0)

    x = logits_ref[...].astype(jnp.float32)          # (TILE_N, C)
    lbl = label_ref[...]                             # (TILE_N, 1) int32
    tn, C = x.shape

    # --- row masking: out-of-bounds tail rows + ignore-index rows ---
    row_ids = pid * tile_n + jax.lax.broadcasted_iota(jnp.int32, (tn, 1), 0)
    in_bounds = row_ids < n_rows
    ignore = jnp.logical_or(lbl == lb_ignore, jnp.logical_not(in_bounds))
    valid = jnp.logical_not(ignore)                  # (TILE_N, 1) bool

    # --- log_softmax pieces (no (TILE_N, C) one_hot/target/logs temporaries) ---
    m = jnp.max(x, axis=1, keepdims=True)            # (TILE_N, 1)
    z = x - m
    lse = jnp.log(jnp.sum(jnp.exp(z), axis=1, keepdims=True))   # (TILE_N, 1)

    # sum_c log_softmax(x)_c = sum_c z_c - C * lse
    sum_logs = jnp.sum(z, axis=1, keepdims=True) - C * lse

    # log_softmax at the label index (ignored rows use class 0; masked later)
    lbl_clean = jnp.where(ignore, 0, lbl)
    cls_iota = jax.lax.broadcasted_iota(jnp.int32, (tn, C), 1)
    z_at_lbl = jnp.sum(jnp.where(cls_iota == lbl_clean, z, 0.0),
                       axis=1, keepdims=True)
    log_at_lbl = z_at_lbl - lse

    # per_row = -(lb_pos*logs[label] + lb_neg*sum_{c != label} logs[c])
    per_row = -(lb_neg * sum_logs + (lb_pos - lb_neg) * log_at_lbl)
    per_row = jnp.where(valid, per_row, 0.0)         # select, so OOB garbage/NaN can't leak

    loss_acc[0] += jnp.sum(per_row)
    valid_acc[0] += jnp.sum(valid.astype(jnp.float32))

    @pl.when(pid == pl.num_programs(0) - 1)
    def _finalize():
        # NOTE: like the PyTorch module, no guard for n_valid == 0 (-> NaN/Inf).
        loss_ref[0, 0] = loss_acc[0] / valid_acc[0]


def _choose_tile_n(n_rows, n_cols, itemsize):
    """Pick a row-tile that keeps each (TILE_N, C) logits block ~4 MiB so the
    double-buffered pipeline stays well inside scoped VMEM on v5e/v6e/v7x."""
    target_bytes = 4 * 1024 * 1024
    t = target_bytes // max(1, n_cols * itemsize)
    t = max(8, (int(t) // 8) * 8)        # second-to-last block dim: multiple of 8
    t = min(t, 1024)
    if n_rows <= t:
        return n_rows                    # full-extent block is always legal
    return t


def label_smooth_softmax_ce(logits, label, *, lb_pos=0.9, lb_neg=0.005,
                            lb_ignore=255, tile_n=None):
    """Pallas TPU implementation of LabelSmoothSoftmaxCE (reduction='mean')."""
    N, C = logits.shape
    label2d = label.reshape(N, 1).astype(jnp.int32)
    if tile_n is None:
        tile_n = _choose_tile_n(N, C, jnp.dtype(logits.dtype).itemsize)
    tile_n = int(tile_n)
    num_blocks = pl.cdiv(N, tile_n)

    kernel = functools.partial(
        _label_smooth_ce_kernel,
        lb_pos=float(lb_pos), lb_neg=float(lb_neg), lb_ignore=int(lb_ignore),
        n_rows=N, tile_n=tile_n)

    out = pl.pallas_call(
        kernel,
        out_shape=jax.ShapeDtypeStruct((1, 1), jnp.float32),
        grid=(num_blocks,),
        in_specs=[
            pl.BlockSpec((tile_n, C), lambda i: (i, 0)),   # logits tile
            pl.BlockSpec((tile_n, 1), lambda i: (i, 0)),   # labels tile
        ],
        out_specs=pl.BlockSpec((1, 1), lambda i: (0, 0),
                               memory_space=pltpu.SMEM),    # scalar loss, resident
        scratch_shapes=[pltpu.SMEM((1,), jnp.float32),       # running loss sum
                        pltpu.SMEM((1,), jnp.float32)],      # running n_valid
        compiler_params=pltpu.CompilerParams(
            dimension_semantics=("arbitrary",)),             # reduction over N
    )(logits, label2d)                                       # no wrapper-side cast
    return out[0, 0]


def _reference(logits, label, lb_pos=0.9, lb_neg=0.005, lb_ignore=255):
    """Pure-JAX reference mirroring the PyTorch forward."""
    logs = jax.nn.log_softmax(logits.astype(jnp.float32), axis=1)
    ignore = (label == lb_ignore)
    n_valid = jnp.sum(~ignore).astype(jnp.float32)
    lbl = jnp.where(ignore, 0, label)
    one_hot = jax.nn.one_hot(lbl, logits.shape[1], dtype=jnp.float32)
    target = lb_pos * one_hot + lb_neg * (1.0 - one_hot)
    target = jnp.where(ignore[:, None], 0.0, target)
    return -jnp.sum(jnp.sum(logs * target, axis=1)) / n_valid


if __name__ == "__main__":
    key = jax.random.PRNGKey(0)
    k1, k2, k3, k4 = jax.random.split(key, 4)

    # Case 1: small single-block case (cassava-style: 5 classes), with ignore.
    N1, C1 = 8, 5
    logits1 = jax.random.normal(k1, (N1, C1), dtype=jnp.float32)
    label1 = jax.random.randint(k2, (N1,), 0, C1, dtype=jnp.int32)
    label1 = label1.at[3].set(255)                      # exercise ignore index
    loss1 = jax.block_until_ready(label_smooth_softmax_ce(logits1, label1))
    ref1 = jax.block_until_ready(_reference(logits1, label1))
    assert jnp.allclose(loss1, ref1, rtol=1e-5, atol=1e-5), (loss1, ref1)

    # Case 2: multi-block grid with a partial tail tile (tests the accumulator
    # init/finalize path and in-kernel tail masking).
    N2, C2 = 20, 5
    logits2 = jax.random.normal(k3, (N2, C2), dtype=jnp.float32)
    label2 = jax.random.randint(k4, (N2,), 0, C2, dtype=jnp.int32)
    label2 = label2.at[0].set(255)
    loss2 = jax.block_until_ready(
        label_smooth_softmax_ce(logits2, label2, tile_n=8))
    ref2 = jax.block_until_ready(_reference(logits2, label2))
    assert jnp.allclose(loss2, ref2, rtol=1e-5, atol=1e-5), (loss2, ref2)

    print("KERNEL_OK")
</pallas_src>

<mosaic_0001>
module attributes {stable_mosaic.version = 11 : i64} {
  func.func @_label_smooth_ce_kernel(%arg0: i32, %arg1: memref<8x5xf32, #tpu.memory_space<vmem>>, %arg2: memref<8x1xi32, #tpu.memory_space<vmem>>, %arg3: memref<1x1xf32, #tpu.memory_space<smem>>, %arg4: memref<1xf32, #tpu.memory_space<smem>>, %arg5: memref<1xf32, #tpu.memory_space<smem>>) attributes {dimension_semantics = [#tpu.dimension_semantics<arbitrary>], iteration_bounds = array<i64: 1>, scalar_prefetch = 0 : i64, scratch_operands = 2 : i64, tpu.core_type = #tpu.core_type<tc>, window_params = [{transform_indices = @transform_0, window_bounds = array<i64: 8, 5>}, {transform_indices = @transform_1, window_bounds = array<i64: 8, 1>}, {transform_indices = @transform_2, window_bounds = array<i64: 1, 1>}]} {
    %c0_i32 = arith.constant 0 : i32
    %0 = arith.cmpi eq, %arg0, %c0_i32 : i32
    %1 = arith.extui %0 : i1 to i32
    %c0_i32_0 = arith.constant 0 : i32
    %2 = arith.cmpi ne, %1, %c0_i32_0 : i32
    scf.if %2 {
      %cst_25 = arith.constant 0.000000e+00 : f32
      %c0_26 = arith.constant 0 : index
      %67 = memref.load %arg4[%c0_26] : memref<1xf32, #tpu.memory_space<smem>>
      memref.store %cst_25, %arg4[%c0_26] : memref<1xf32, #tpu.memory_space<smem>>
      %cst_27 = arith.constant 0.000000e+00 : f32
      %c0_28 = arith.constant 0 : index
      %68 = memref.load %arg5[%c0_28] : memref<1xf32, #tpu.memory_space<smem>>
      memref.store %cst_27, %arg5[%c0_28] : memref<1xf32, #tpu.memory_space<smem>>
    } else {
    }
    %c0 = arith.constant 0 : index
    %c0_1 = arith.constant 0 : index
    %3 = vector.load %arg1[%c0, %c0_1] : memref<8x5xf32, #tpu.memory_space<vmem>>, vector<8x5xf32>
    %c0_2 = arith.constant 0 : index
    %c0_3 = arith.constant 0 : index
    %4 = vector.load %arg2[%c0_2, %c0_3] : memref<8x1xi32, #tpu.memory_space<vmem>>, vector<8x1xi32>
    %c8_i32 = arith.constant 8 : i32
    %5 = arith.muli %arg0, %c8_i32 : i32
    %6 = tpu.iota {dimensions = array<i32: 0>} : vector<8x1xi32>
    %7 = vector.broadcast %5 : i32 to vector<8x1xi32>
    %8 = arith.addi %7, %6 : vector<8x1xi32>
    %c8_i32_4 = arith.constant 8 : i32
    %9 = vector.broadcast %c8_i32_4 : i32 to vector<8x1xi32>
    %10 = arith.cmpi slt, %8, %9 : vector<8x1xi32>
    %c255_i32 = arith.constant 255 : i32
    %11 = vector.broadcast %c255_i32 : i32 to vector<8x1xi32>
    %12 = arith.cmpi eq, %4, %11 : vector<8x1xi32>
    %cst = arith.constant dense<true> : vector<8x1xi1>
    %13 = arith.xori %10, %cst : vector<8x1xi1>
    %14 = arith.ori %12, %13 : vector<8x1xi1>
    %cst_5 = arith.constant dense<true> : vector<8x1xi1>
    %15 = arith.xori %14, %cst_5 : vector<8x1xi1>
    %cst_6 = arith.constant dense<0xFF800000> : vector<8xf32>
    %16 = vector.multi_reduction <maximumf>, %3, %cst_6 [1] : vector<8x5xf32> to vector<8xf32>
    %17 = vector.shape_cast %16 : vector<8xf32> to vector<8x1xf32>
    %18 = vector.broadcast %17 : vector<8x1xf32> to vector<8x5xf32>
    %19 = arith.subf %3, %18 : vector<8x5xf32>
    %20 = math.exp %19 : vector<8x5xf32>
    %cst_7 = arith.constant dense<0.000000e+00> : vector<8xf32>
    %21 = vector.multi_reduction <add>, %20, %cst_7 [1] : vector<8x5xf32> to vector<8xf32>
    %22 = vector.shape_cast %21 : vector<8xf32> to vector<8x1xf32>
    %23 = math.log %22 : vector<8x1xf32>
    %cst_8 = arith.constant dense<0.000000e+00> : vector<8xf32>
    %24 = vector.multi_reduction <add>, %19, %cst_8 [1] : vector<8x5xf32> to vector<8xf32>
    %25 = vector.shape_cast %24 : vector<8xf32> to vector<8x1xf32>
    %cst_9 = arith.constant 5.000000e+00 : f32
    %26 = vector.broadcast %cst_9 : f32 to vector<8x1xf32>
    %27 = arith.mulf %26, %23 : vector<8x1xf32>
    %28 = arith.subf %25, %27 : vector<8x1xf32>
    %c0_i32_10 = arith.constant 0 : i32
    %29 = vector.broadcast %c0_i32_10 : i32 to vector<8x1xi32>
    %30 = arith.select %14, %29, %4 : vector<8x1xi1>, vector<8x1xi32>
    %31 = tpu.iota {dimensions = array<i32: 1>} : vector<8x5xi32>
    %32 = vector.broadcast %30 : vector<8x1xi32> to vector<8x5xi32>
    %33 = arith.cmpi eq, %31, %32 : vector<8x5xi32>
    %cst_11 = arith.constant 0.000000e+00 : f32
    %34 = vector.broadcast %cst_11 : f32 to vector<8x5xf32>
    %35 = arith.select %33, %19, %34 : vector<8x5xi1>, vector<8x5xf32>
    %cst_12 = arith.constant dense<0.000000e+00> : vector<8xf32>
    %36 = vector.multi_reduction <add>, %35, %cst_12 [1] : vector<8x5xf32> to vector<8xf32>
    %37 = vector.shape_cast %36 : vector<8xf32> to vector<8x1xf32>
    %38 = arith.subf %37, %23 : vector<8x1xf32>
    %cst_13 = arith.constant 5.000000e-03 : f32
    %39 = vector.broadcast %cst_13 : f32 to vector<8x1xf32>
    %40 = arith.mulf %39, %28 : vector<8x1xf32>
    %cst_14 = arith.constant 0.89499998 : f32
    %41 = vector.broadcast %cst_14 : f32 to vector<8x1xf32>
    %42 = arith.mulf %41, %38 : vector<8x1xf32>
    %43 = arith.addf %40, %42 : vector<8x1xf32>
    %cst_15 = arith.constant 0.000000e+00 : f32
    %44 = vector.broadcast %cst_15 : f32 to vector<8x1xf32>
    %45 = arith.subf %44, %43 : vector<8x1xf32>
    %cst_16 = arith.constant 0.000000e+00 : f32
    %46 = vector.broadcast %cst_16 : f32 to vector<8x1xf32>
    %47 = arith.select %15, %45, %46 : vector<8x1xi1>, vector<8x1xf32>
    %c0_17 = arith.constant 0 : index
    %48 = memref.load %arg4[%c0_17] : memref<1xf32, #tpu.memory_space<smem>>
    %49 = vector.shape_cast %47 : vector<8x1xf32> to vector<1x8x1xf32>
    %cst_18 = arith.constant dense<0.000000e+00> : vector<1xf32>
    %50 = vector.multi_reduction <add>, %49, %cst_18 [1, 2] : vector<1x8x1xf32> to vector<1xf32>
    %51 = vector.shape_cast %50 : vector<1xf32> to vector<1x1x1xf32>
    %52 = vector.extract %51[0, 0, 0] : f32 from vector<1x1x1xf32>
    %53 = arith.addf %48, %52 : f32
    %c0_19 = arith.constant 0 : index
    %54 = memref.load %arg4[%c0_19] : memref<1xf32, #tpu.memory_space<smem>>
    memref.store %53, %arg4[%c0_19] : memref<1xf32, #tpu.memory_space<smem>>
    %c0_20 = arith.constant 0 : index
    %55 = memref.load %arg5[%c0_20] : memref<1xf32, #tpu.memory_space<smem>>
    %56 = arith.extui %15 : vector<8x1xi1> to vector<8x1xi32>
    %57 = arith.sitofp %56 : vector<8x1xi32> to vector<8x1xf32>
    %58 = vector.shape_cast %57 : vector<8x1xf32> to vector<1x8x1xf32>
    %cst_21 = arith.constant dense<0.000000e+00> : vector<1xf32>
    %59 = vector.multi_reduction <add>, %58, %cst_21 [1, 2] : vector<1x8x1xf32> to vector<1xf32>
    %60 = vector.shape_cast %59 : vector<1xf32> to vector<1x1x1xf32>
    %61 = vector.extract %60[0, 0, 0] : f32 from vector<1x1x1xf32>
    %62 = arith.addf %55, %61 : f32
    %c0_22 = arith.constant 0 : index
    %63 = memref.load %arg5[%c0_22] : memref<1xf32, #tpu.memory_space<smem>>
    memref.store %62, %arg5[%c0_22] : memref<1xf32, #tpu.memory_space<smem>>
    %c0_i32_23 = arith.constant 0 : i32
    %64 = arith.cmpi eq, %arg0, %c0_i32_23 : i32
    %65 = arith.extui %64 : i1 to i32
    %c0_i32_24 = arith.constant 0 : i32
    %66 = arith.cmpi ne, %65, %c0_i32_24 : i32
    scf.if %66 {
      %c0_25 = arith.constant 0 : index
      %67 = memref.load %arg4[%c0_25] : memref<1xf32, #tpu.memory_space<smem>>
      %c0_26 = arith.constant 0 : index
      %68 = memref.load %arg5[%c0_26] : memref<1xf32, #tpu.memory_space<smem>>
      %69 = arith.divf %67, %68 : f32
      %c0_27 = arith.constant 0 : index
      %c0_28 = arith.constant 0 : index
      %70 = memref.load %arg3[%c0_27, %c0_28] : memref<1x1xf32, #tpu.memory_space<smem>>
      memref.store %69, %arg3[%c0_27, %c0_28] : memref<1x1xf32, #tpu.memory_space<smem>>
    } else {
    }
    return
  }
  func.func @transform_0(%arg0: i32) -> (i32, i32) {
    %c0_i32 = arith.constant 0 : i32
    %c0_i32_0 = arith.constant 0 : i32
    return %arg0, %c0_i32 : i32, i32
  }
  func.func @transform_1(%arg0: i32) -> (i32, i32) {
    %c0_i32 = arith.constant 0 : i32
    %c0_i32_0 = arith.constant 0 : i32
    return %arg0, %c0_i32 : i32, i32
  }
  func.func @transform_2(%arg0: i32) -> (i32, i32) {
    %c0_i32 = arith.constant 0 : i32
    %c0_i32_0 = arith.constant 0 : i32
    %c0_i32_1 = arith.constant 0 : i32
    return %c0_i32, %c0_i32_0 : i32, i32
  }
}

</mosaic_0001>

<bundles_post_ra>
// kernel: tpu_custom_call.1
= control target key start
LH: loop header
LB: loop body
LE: loop exit
PB: predicated region body
PF: predicated region fallthrough
CT: control target
= control target key end

     0   :  { %vm32_vm0 = vcmask 39936   ;;  %s183_s0 = inlined_call_operand.vmem [shape: f32[8,5], index: 0, kind: input, shape index: {}]   ;;  %s184_s1 = inlined_call_operand.vmem [shape: s32[8,1], index: 1, kind: input, shape index: {}]   ;;  %s185_s2 = inlined_call_operand.hbm [shape: f32[1,1], index: 2, kind: output, shape index: {}]  }
   0x1   :  { %v20_v0 = vld [vmem:[%s183_s0] sm:$0xff] }
   0x2   :  { %7 = vsyncpa [#allocation5], 0  ;;  %v33_v1 = vsel %vm32_vm0, %v20_v0, -inf  ;;  %v149_v2 = vmov 0   ;;  %v21_v3 = vld [vmem:[%s184_s1] sm:$0xff]  ;;  %v50_v8 = vlaneseq  ;;  %vm150_vm3 = vmmov 1  }
   0x3   :  { %132 = vset.pattern.permute.xlu0 %v149_v2  ;;  %vm28_vm1 = vcmp.eq.s32.totalorder %v21_v3, 255  ;;  %vm67_vm5 = vcmask 7168   ;;  %v151_v29 = vmov 0.0   ;;  %s152_s15 = smov [#allocation4]  }
   0x4   :  { %34 = vmax.xlane.f32.xlu0 %v33_v1  ;;  %v49_v4 = vsel %vm28_vm1, 0, %v21_v3  ;;  %v51_v9 = vand.u32 127, %v50_v8  ;;  %vm31_vm4 = vmxor %vm28_vm1, %vm150_vm3 }
   0x5   :  { %v121_v30 = vsel %vm31_vm4, 1.0, %v151_v29 }
   0x6   :  { %v84_v32 = vsel %vm67_vm5, %v121_v30, 0.0 }
  0x1a   :  { %53 = vperm.xlu0 %132, %v49_v4  }
  0x8d   :  { %v35_v5 = vpop.xlane.xlu0 %34 }
  0x8e   :  { %v36_v6 = vsub.f32 %v20_v0, %v35_v5 }
  0x90   :  { %v37_v7 = vmul.f32 1.442695, %v36_v6  ;;  %v44_v13 = vsel %vm32_vm0, %v36_v6, 0.0 }
  0x92   :  { %133 = vpow2.f32 %v37_v7 }
  0x95   :  { %v54_v11 = vpop.permute.xlu0 %53 }
  0x96   :  { %vm55_vm2 = vcmp.eq.s32.totalorder %v51_v9, %v54_v11 }
  0x97   :  { %v56_v14 = vsel %vm55_vm2, %v36_v6, 0.0 }
  0x98   :  { %v57_v15 = vsel %vm32_vm0, %v56_v14, 0.0 }
  0x9f   :  { %v134_v10 = vpop.eup %133 }
  0xa0   :  { %v39_v12 = vsel %vm32_vm0, %v134_v10, 0.0 }
  0xa1   :  { %40 = vadd.xlane.f32.xlu1 %v39_v12 }
  0xa5   :  { %45 = vadd.xlane.f32.xlu1 %v44_v13 }
  0xa9   :  { %58 = vadd.xlane.f32.xlu1 %v57_v15 }
 0x12a   :  { %v41_v16 = vpop.xlane.xlu1 %40 }
 0x12b   :  { %135 = vlog2.f32 %v41_v16 }
 0x12e   :  { %v46_v17 = vpop.xlane.xlu1 %45 }
 0x132   :  { %v59_v20 = vpop.xlane.xlu1 %58 }
 0x138   :  { %v136_v18 = vpop.eup %135 }
 0x139   :  { %v43_v19 = vmul.f32 0.6931472, %v136_v18 }
 0x13b   :  { %v47_v21 = vmul.f32 5.0, %v43_v19  ;;  %v60_v22 = vsub.f32 %v59_v20, %v43_v19 }
 0x13d   :  { %v48_v23 = vsub.f32 %v46_v17, %v47_v21  ;;  %v62_v25 = vmul.f32 0.895, %v60_v22 }
 0x13f   :  { %v61_v24 = vmul.f32 0.005, %v48_v23 }
 0x141   :  { %v63_v26 = vadd.f32 %v62_v25, %v61_v24 }
 0x143   :  { %v64_v27 = vsub.f32 0.0, %v63_v26 }
 0x145   :  { %v65_v28 = vsel %vm31_vm4, %v64_v27, 0.0 }
 0x146   :  { %v68_v31 = vsel %vm67_vm5, %v65_v28, 0.0 }
 0x147   :  { %69 = vadd.xlane.f32.xlu1 %v68_v31 }
 0x14b   :  { %85 = vadd.xlane.f32.xlu1 %v84_v32 }
 0x1d0   :  { %v70_v33 = vpop.xlane.xlu1 %69 }
 0x1d1   :  { %v71_v34 = vrot.slane %v70_v33, 4 }
 0x1d3   :  { %v72_v35 = vadd.f32 %v71_v34, %v70_v33 }
 0x1d4   :  { %v86_v36 = vpop.xlane.xlu1 %85 }
 0x1d5   :  { %v73_v37 = vrot.slane %v72_v35, 2  ;;  %v87_v38 = vrot.slane %v86_v36, 4 }
 0x1d7   :  { %v88_v39 = vadd.f32 %v87_v38, %v86_v36  ;;  %v74_v40 = vadd.f32 %v73_v37, %v72_v35 }
 0x1d9   :  { %v89_v41 = vrot.slane %v88_v39, 2  ;;  %v75_v42 = vrot.slane %v74_v40, 1 }
 0x1db   :  { %v90_v43 = vadd.f32 %v89_v41, %v88_v39  ;;  %v76_v44 = vadd.f32 %v75_v42, %v74_v40 }
 0x1dd   :  { %122 = vpush %v76_v44  ;;  %v91_v45 = vrot.slane %v90_v43, 1 }
 0x1df   :  { %v92_v46 = vadd.f32 %v91_v45, %v90_v43 }
 0x1e1   :  { %124 = vpush %v92_v46 }
 0x20e   :  { %s123_s0 = spop %122 }
 0x212   :  { %s125_s1 = spop %124 }
 0x213   :  { %v102_v47 = vstv %s125_s1 }
 0x214   :  { %137 = vrcp.f32 %v102_v47 }
 0x221   :  { %v138_v48 = vpop.eup %137 }
 0x222   :  { %126 = vpush %v138_v48 }
 0x253   :  { %s127_s13 = spop %126 }
 0x254   :  { %s105_s14 = smul.f32 %s127_s13, %s123_s0 }
 0x256   :  { %107 = sst [smem:[#allocation4]] %s105_s14 }
 0x257   :  { %115 = dma.smem_to_hbm %s152_s15, 16, %s185_s2, [#allocation5]  }
 0x258   :  { %147 = dma.done.wait [#allocation5], 16  }
 0x259   :  { %148 = vsyncadd [#allocation5], 4294967280 }
 0x25a   :  { %119 = sfence }
 0x25b   :  { %120 = vsyncpa [#allocation5], 1 }

</bundles_post_ra>
